<compile_context>
chip_gen: v7x
topology: tpu7x:2x2x1
jax: 0.10.0
libtpu: 0.0.40
codegen_flags: <defaults>
</compile_context>

<pallas_src>
import jax
import jax.numpy as jnp
from jax.experimental import pallas as pl
from jax.experimental.pallas import tpu as pltpu


def _round_up(x, m):
    return ((x + m - 1) // m) * m


def ffn_kernel(x_ref, w1_ref, b1_ref, w2_ref, b2_ref, o_ref, acc_ref):
    # x_ref:  (TM, D)          w1_ref: (D, TH) bf16     b1_ref: (1, TH) f32
    # w2_ref: (TH, DOUT) bf16  b2_ref: (1, DOUT) f32
    # o_ref:  (TM, DOUT)       acc_ref: (TM, DOUT) f32 (resident across H axis)
    h = pl.program_id(1)

    @pl.when(h == 0)
    def _init():
        acc_ref[...] = jnp.zeros_like(acc_ref)

    # ---- Linear(dim -> hidden) on the MXU: bf16 x bf16 -> f32 ----
    xb = x_ref[...].astype(jnp.bfloat16)
    pre = jnp.dot(xb, w1_ref[...], preferred_element_type=jnp.float32)
    pre = pre + b1_ref[...].astype(jnp.float32)

    # ---- GELU (EUP tanh/exp path) ----
    # TODO(synk): torch nn.GELU() default is the exact erf GELU; the tanh
    # approximation is used for guaranteed Mosaic lowering (max dev ~3e-4).
    act = jax.nn.gelu(pre, approximate=True)

    # ---- Linear(hidden -> dim): partial sum over this hidden slab ----
    acc_ref[...] += jnp.dot(act.astype(jnp.bfloat16), w2_ref[...],
                            preferred_element_type=jnp.float32)

    @pl.when(h == pl.num_programs(1) - 1)
    def _finalize():
        o_ref[...] = (acc_ref[...] + b2_ref[...].astype(jnp.float32)).astype(o_ref.dtype)


def feedforward_forward(x, w1, b1, w2, b2, *, tile_rows=256, tile_hidden=512):
    """x: (B, S, D) -> (B, S, D).  Fused Linear(D->H) + GELU + Linear(H->D).

    Dropout is the identity (module default p=0.0 / eval mode).
    """
    B, S, D = x.shape
    H = w1.shape[1]
    DOUT = w2.shape[1]
    R = B * S

    xf = x.reshape(R, D)

    # Large row tiles fill the MXU and amortize per-grid-step overhead; clamp
    # for tiny inputs and pad the row count so the grid divides evenly.
    tm = min(tile_rows, _round_up(R, 8))
    r_pad = _round_up(R, tm)
    if r_pad != R:
        xf = jnp.pad(xf, ((0, r_pad - R), (0, 0)))

    # Hidden-dim slabs bound per-step VMEM regardless of hidden_dim.  Padding
    # H with zero columns of W1 / zero b1 / zero rows of W2 is exact:
    # GELU(0) = 0 and zero W2 rows contribute nothing to the accumulation.
    if H % tile_hidden == 0:
        th, h_pad = tile_hidden, H
    elif H <= tile_hidden:
        th, h_pad = H, H                     # single slab, full-dim block (legal)
    else:
        th = tile_hidden
        h_pad = _round_up(H, th)
    # TODO(synk): for very large D (>= ~2048) also tile the first-matmul
    # reduction dim; here D stays a single resident slab (small-model spec).

    # Stream weights as bf16 (native MXU input dtype, half the DMA traffic —
    # they are re-fetched once per row tile).
    w1b = w1.astype(jnp.bfloat16)
    w2b = w2.astype(jnp.bfloat16)
    b1f = b1.reshape(1, H).astype(jnp.float32)
    b2f = b2.reshape(1, DOUT).astype(jnp.float32)
    if h_pad != H:
        w1b = jnp.pad(w1b, ((0, 0), (0, h_pad - H)))
        b1f = jnp.pad(b1f, ((0, 0), (0, h_pad - H)))
        w2b = jnp.pad(w2b, ((0, h_pad - H), (0, 0)))

    grid = (r_pad // tm, h_pad // th)

    out = pl.pallas_call(
        ffn_kernel,
        out_shape=jax.ShapeDtypeStruct((r_pad, DOUT), x.dtype),
        grid_spec=pltpu.PrefetchScalarGridSpec(
            num_scalar_prefetch=0,
            grid=grid,
            in_specs=[
                pl.BlockSpec((tm, D), lambda i, h: (i, 0)),       # x rows (resident across h)
                pl.BlockSpec((D, th), lambda i, h: (0, h)),       # W1 slab
                pl.BlockSpec((1, th), lambda i, h: (0, h)),       # b1 slab
                pl.BlockSpec((th, DOUT), lambda i, h: (h, 0)),    # W2 slab
                pl.BlockSpec((1, DOUT), lambda i, h: (0, 0)),     # b2
            ],
            out_specs=pl.BlockSpec((tm, DOUT), lambda i, h: (i, 0)),
            scratch_shapes=[pltpu.VMEM((tm, DOUT), jnp.float32)],
        ),
        compiler_params=pltpu.CompilerParams(
            dimension_semantics=("parallel", "arbitrary"),
            vmem_limit_bytes=32 * 1024 * 1024,
        ),
    )(xf, w1b, b1f, w2b, b2f)

    return out[:R].reshape(B, S, DOUT)


def ffn_reference_f32(x, w1, b1, w2, b2):
    xf = x.astype(jnp.float32)
    pre = xf @ w1.astype(jnp.float32) + b1
    act = jax.nn.gelu(pre, approximate=True)
    return (act @ w2.astype(jnp.float32) + b2).astype(x.dtype)


def ffn_reference_mixed(x, w1, b1, w2, b2):
    # Mirrors the kernel's mixed precision (bf16 MXU inputs, f32 accumulation).
    xb = x.astype(jnp.bfloat16)
    pre = jnp.dot(xb, w1.astype(jnp.bfloat16),
                  preferred_element_type=jnp.float32) + b1
    act = jax.nn.gelu(pre, approximate=True)
    y = jnp.dot(act.astype(jnp.bfloat16), w2.astype(jnp.bfloat16),
                preferred_element_type=jnp.float32) + b2
    return y.astype(x.dtype)


if __name__ == "__main__":
    key = jax.random.PRNGKey(0)
    B, S, D, H = 2, 8, 32, 64   # batch=2, seq=8, dim=32, hidden_dim=64

    kx, kw1, kb1, kw2, kb2 = jax.random.split(key, 5)
    x = jax.random.normal(kx, (B, S, D), dtype=jnp.float32)
    # nn.Linear weights (stored transposed vs torch: (in, out)), small scale.
    w1 = jax.random.normal(kw1, (D, H), dtype=jnp.float32) * 0.05
    b1 = jax.random.normal(kb1, (H,), dtype=jnp.float32) * 0.01
    w2 = jax.random.normal(kw2, (H, D), dtype=jnp.float32) * 0.05
    b2 = jax.random.normal(kb2, (D,), dtype=jnp.float32) * 0.01

    out = feedforward_forward(x, w1, b1, w2, b2)
    out = jax.block_until_ready(out)
    assert out.shape == (B, S, D)

    ref_mixed = ffn_reference_mixed(x, w1, b1, w2, b2)
    ref_f32 = ffn_reference_f32(x, w1, b1, w2, b2)
    # Tight check vs identical mixed-precision math; loose check vs pure f32.
    assert jnp.max(jnp.abs(out - ref_mixed)) < 1e-3
    assert jnp.max(jnp.abs(out - ref_f32)) < 2e-2

    print("KERNEL_OK")
</pallas_src>

<mosaic_0001>
module attributes {stable_mosaic.version = 11 : i64} {
  func.func @ffn_kernel(%arg0: i32, %arg1: i32, %arg2: memref<16x32xf32, #tpu.memory_space<vmem>>, %arg3: memref<32x64xbf16, #tpu.memory_space<vmem>>, %arg4: memref<1x64xf32, #tpu.memory_space<vmem>>, %arg5: memref<64x32xbf16, #tpu.memory_space<vmem>>, %arg6: memref<1x32xf32, #tpu.memory_space<vmem>>, %arg7: memref<16x32xf32, #tpu.memory_space<vmem>>, %arg8: memref<16x32xf32, #tpu.memory_space<vmem>>) attributes {dimension_semantics = [#tpu.dimension_semantics<parallel>, #tpu.dimension_semantics<arbitrary>], iteration_bounds = array<i64: 1, 1>, scalar_prefetch = 0 : i64, scratch_operands = 1 : i64, tpu.core_type = #tpu.core_type<tc>, window_params = [{transform_indices = @transform_0, window_bounds = array<i64: 16, 32>}, {transform_indices = @transform_1, window_bounds = array<i64: 32, 64>}, {transform_indices = @transform_2, window_bounds = array<i64: 1, 64>}, {transform_indices = @transform_3, window_bounds = array<i64: 64, 32>}, {pipeline_mode = #tpu.pipeline_mode<synchronous>, transform_indices = @transform_4, window_bounds = array<i64: 1, 32>}, {transform_indices = @transform_5, window_bounds = array<i64: 16, 32>}]} {
    %c0_i32 = arith.constant 0 : i32
    %0 = arith.cmpi eq, %arg1, %c0_i32 : i32
    %1 = arith.extui %0 : i1 to i32
    %c0_i32_0 = arith.constant 0 : i32
    %2 = arith.cmpi ne, %1, %c0_i32_0 : i32
    scf.if %2 {
      %cst_19 = arith.constant 0.000000e+00 : f32
      %32 = vector.broadcast %cst_19 : f32 to vector<16x32xf32>
      %c0_20 = arith.constant 0 : index
      %c0_21 = arith.constant 0 : index
      %33 = vector.load %arg8[%c0_20, %c0_21] : memref<16x32xf32, #tpu.memory_space<vmem>>, vector<16x32xf32>
      tpu.vector_store %arg8[%c0_20, %c0_21], %32 {strides = array<i32>} : memref<16x32xf32, #tpu.memory_space<vmem>>, vector<16x32xf32>,
    } else {
    }
    %c0 = arith.constant 0 : index
    %c0_1 = arith.constant 0 : index
    %3 = vector.load %arg2[%c0, %c0_1] : memref<16x32xf32, #tpu.memory_space<vmem>>, vector<16x32xf32>
    %4 = arith.truncf %3 : vector<16x32xf32> to vector<16x32xbf16>
    %c0_2 = arith.constant 0 : index
    %c0_3 = arith.constant 0 : index
    %5 = vector.load %arg3[%c0_2, %c0_3] : memref<32x64xbf16, #tpu.memory_space<vmem>>, vector<32x64xbf16>
    %cst = arith.constant dense<0.000000e+00> : vector<16x64xf32>
    %6 = tpu.matmul %4, %5, %cst {dimension_numbers = #tpu.dot_dimension_numbers<[1], [0], [0], [1], [0, 0, 1, 1], [], []>} : vector<16x32xbf16>, vector<32x64xbf16>, vector<16x64xf32> -> vector<16x64xf32>
    %c0_4 = arith.constant 0 : index
    %c0_5 = arith.constant 0 : index
    %7 = vector.load %arg4[%c0_4, %c0_5] : memref<1x64xf32, #tpu.memory_space<vmem>>, vector<1x64xf32>
    %8 = vector.broadcast %7 : vector<1x64xf32> to vector<16x64xf32>
    %9 = arith.addf %6, %8 : vector<16x64xf32>
    %10 = arith.mulf %9, %9 : vector<16x64xf32>
    %11 = arith.mulf %9, %10 : vector<16x64xf32>
    %cst_6 = arith.constant 4.471500e-02 : f32
    %12 = vector.broadcast %cst_6 : f32 to vector<16x64xf32>
    %13 = arith.mulf %12, %11 : vector<16x64xf32>
    %14 = arith.addf %9, %13 : vector<16x64xf32>
    %cst_7 = arith.constant 0.797884583 : f32
    %15 = vector.broadcast %cst_7 : f32 to vector<16x64xf32>
    %16 = arith.mulf %15, %14 : vector<16x64xf32>
    %17 = math.tanh %16 : vector<16x64xf32>
    %cst_8 = arith.constant 1.000000e+00 : f32
    %18 = vector.broadcast %cst_8 : f32 to vector<16x64xf32>
    %19 = arith.addf %18, %17 : vector<16x64xf32>
    %cst_9 = arith.constant 5.000000e-01 : f32
    %20 = vector.broadcast %cst_9 : f32 to vector<16x64xf32>
    %21 = arith.mulf %20, %19 : vector<16x64xf32>
    %22 = arith.mulf %9, %21 : vector<16x64xf32>
    %c0_10 = arith.constant 0 : index
    %c0_11 = arith.constant 0 : index
    %23 = vector.load %arg8[%c0_10, %c0_11] : memref<16x32xf32, #tpu.memory_space<vmem>>, vector<16x32xf32>
    %24 = arith.truncf %22 : vector<16x64xf32> to vector<16x64xbf16>
    %c0_12 = arith.constant 0 : index
    %c0_13 = arith.constant 0 : index
    %25 = vector.load %arg5[%c0_12, %c0_13] : memref<64x32xbf16, #tpu.memory_space<vmem>>, vector<64x32xbf16>
    %cst_14 = arith.constant dense<0.000000e+00> : vector<16x32xf32>
    %26 = tpu.matmul %24, %25, %cst_14 {dimension_numbers = #tpu.dot_dimension_numbers<[1], [0], [0], [1], [0, 0, 1, 1], [], []>} : vector<16x64xbf16>, vector<64x32xbf16>, vector<16x32xf32> -> vector<16x32xf32>
    %27 = arith.addf %23, %26 : vector<16x32xf32>
    %c0_15 = arith.constant 0 : index
    %c0_16 = arith.constant 0 : index
    %28 = vector.load %arg8[%c0_15, %c0_16] : memref<16x32xf32, #tpu.memory_space<vmem>>, vector<16x32xf32>
    tpu.vector_store %arg8[%c0_15, %c0_16], %27 {strides = array<i32>} : memref<16x32xf32, #tpu.memory_space<vmem>>, vector<16x32xf32>,
    %c0_i32_17 = arith.constant 0 : i32
    %29 = arith.cmpi eq, %arg1, %c0_i32_17 : i32
    %30 = arith.extui %29 : i1 to i32
    %c0_i32_18 = arith.constant 0 : i32
    %31 = arith.cmpi ne, %30, %c0_i32_18 : i32
    scf.if %31 {
      %c0_19 = arith.constant 0 : index
      %c0_20 = arith.constant 0 : index
      %32 = vector.load %arg8[%c0_19, %c0_20] : memref<16x32xf32, #tpu.memory_space<vmem>>, vector<16x32xf32>
      %c0_21 = arith.constant 0 : index
      %c0_22 = arith.constant 0 : index
      %33 = vector.load %arg6[%c0_21, %c0_22] : memref<1x32xf32, #tpu.memory_space<vmem>>, vector<1x32xf32>
      %34 = vector.broadcast %33 : vector<1x32xf32> to vector<16x32xf32>
      %35 = arith.addf %32, %34 : vector<16x32xf32>
      %c0_23 = arith.constant 0 : index
      %c0_24 = arith.constant 0 : index
      %36 = vector.load %arg7[%c0_23, %c0_24] : memref<16x32xf32, #tpu.memory_space<vmem>>, vector<16x32xf32>
      tpu.vector_store %arg7[%c0_23, %c0_24], %35 {strides = array<i32>} : memref<16x32xf32, #tpu.memory_space<vmem>>, vector<16x32xf32>,
    } else {
    }
    return
  }
  func.func @transform_0(%arg0: i32, %arg1: i32) -> (i32, i32) {
    %c0_i32 = arith.constant 0 : i32
    %c0_i32_0 = arith.constant 0 : i32
    return %arg0, %c0_i32 : i32, i32
  }
  func.func @transform_1(%arg0: i32, %arg1: i32) -> (i32, i32) {
    %c0_i32 = arith.constant 0 : i32
    %c0_i32_0 = arith.constant 0 : i32
    return %c0_i32, %arg1 : i32, i32
  }
  func.func @transform_2(%arg0: i32, %arg1: i32) -> (i32, i32) {
    %c0_i32 = arith.constant 0 : i32
    %c0_i32_0 = arith.constant 0 : i32
    return %c0_i32, %arg1 : i32, i32
  }
  func.func @transform_3(%arg0: i32, %arg1: i32) -> (i32, i32) {
    %c0_i32 = arith.constant 0 : i32
    %c0_i32_0 = arith.constant 0 : i32
    return %arg1, %c0_i32 : i32, i32
  }
  func.func @transform_4(%arg0: i32, %arg1: i32) -> (i32, i32) {
    %c0_i32 = arith.constant 0 : i32
    %c0_i32_0 = arith.constant 0 : i32
    %c0_i32_1 = arith.constant 0 : i32
    return %c0_i32, %c0_i32_0 : i32, i32
  }
  func.func @transform_5(%arg0: i32, %arg1: i32) -> (i32, i32) {
    %c0_i32 = arith.constant 0 : i32
    %c0_i32_0 = arith.constant 0 : i32
    return %arg0, %c0_i32 : i32, i32
  }
}

</mosaic_0001>

<bundles_post_ra>
// kernel: tpu_custom_call.1
= control target key start
LH: loop header
LB: loop body
LE: loop exit
PB: predicated region body
PF: predicated region fallthrough
CT: control target
= control target key end

     0   :  { %v311_v1 = vmov 0.0   ;;  %vm312_vm0 = vmmov 0   ;;  %vm26_vm1 = vcmask 261120   ;;  %s395_s0 = inlined_call_operand.vmem [shape: f32[16,32], index: 0, kind: input, shape index: {}]   ;;  %s396_s1 = inlined_call_operand.vmem [shape: bf16[32,64], index: 1, kind: input, shape index: {}]   ;;  %s397_s2 = inlined_call_operand.vmem [shape: f32[1,64], index: 2, kind: input, shape index: {}]   ;;  %s398_s3 = inlined_call_operand.vmem [shape: bf16[64,32], index: 3, kind: input, shape index: {}]   ;;  %s399_s4 = inlined_call_operand.vmem [shape: f32[1,32], index: 4, kind: input, shape index: {}]   ;;  %s400_s5 = inlined_call_operand.hbm [shape: f32[16,32], index: 5, kind: output, shape index: {}]  }
   0x1   :  { %v277_v0 = vld [vmem:[%s396_s1] sm:$0xff]   ;;  %252 = vmatprep.subr.bf16.mxu0 %v311_v1  ;;  %260 = vmatprep.subr.bf16.mxu1 %v311_v1  ;;  %v278_v2 = vld [vmem:[%s396_s1 + $0x8] sm:$0xff]   ;;  %27 = vst.msk [vmem:[#allocation2] sm:$0xff] %vm26_vm1, %v311_v1  ;;  %28 = vst.msk [vmem:[#allocation2 + $0x8] sm:$0xff] %vm26_vm1, %v311_v1 }
   0x2   :  { %253 = vmatpush3.bf16.msra.mxu0 %v277_v0  ;;  %256 = vmatprep.mubr.msk.bf16.mxu0 %vm312_vm0, %v311_v1  ;;  %v29_v3 = vld [vmem:[%s395_s0] sm:$0xff]  ;;  %v30_v4 = vld [vmem:[%s395_s0 + $0x8] sm:$0xff] }
   0x3   :  { %254 = vmatprep.subr.bf16.mxu0 %v311_v1  ;;  %268 = vmatprep.mubr.msk.bf16.mxu1 %vm312_vm0, %v311_v1  ;;  %v31_v5 = vpack.c.bf16 %v30_v4, %v29_v3 }
   0x4   :  { %10 = vsyncpa [#allocation4], 0  ;;  %v279_v6 = vld [vmem:[%s398_s3] sm:$0xff]   ;;  %v280_v7 = vld [vmem:[%s398_s3 + $0x8] sm:$0xff]   ;;  %vm153_vm2 = vcmask 523264   ;;  %s313_s9 = smov [#allocation3]  }
   0x5   :  { %261 = vmatpush3.bf16.msra.mxu1 %v279_v6  ;;  %v281_v8 = vld [vmem:[%s398_s3 + $0x10] sm:$0xff]   ;;  %v282_v9 = vld [vmem:[%s398_s3 + $0x18] sm:$0xff]   ;;  %v234_v10 = vld [vmem:[%s397_s2] ss:$0 sm:$0xff]  ;;  %s223_s10 = sshll.u32 %s313_s9, 4  ;;  %s224_s10 = int_to_ptr.vmem [resolvable:$true] %s223_s10 }
   0x6   :  { %255 = vmatpush3.bf16.msra.mxu0 %v278_v2  ;;  %262 = vmatprep.subr.bf16.mxu1 %v311_v1  ;;  %v243_v44 = vld [vmem:[%s399_s4] ss:$0 sm:$0xff]  ;;  %s287_s11 = scalar_lea.vmem %s224_s10, 256  ;;  %p292_p1 = scmp.lt.s32.totalorder %s224_s10, %s224_s10 }
   0x7   :  { %p288_p0 = scmp.ne.s32.totalorder %s224_s10, %s287_s11  ;;  %p293_p2 = scmp.lt.s32.totalorder %s287_s11, %s287_s11 }
   0x8   :  { %v118_v36 = vld [vmem:[#allocation2] sm:$0xff]  ;;  %v119_v38 = vld [vmem:[#allocation2 + $0x8] sm:$0xff] }
   0x9   :  { %257 = vmatmul.mubr.msk.bf16.vlgmr.msra.gmra.mrb[0].mxu0 %vm26_vm1, %v31_v5  ;;  %263 = vmatpush3.bf16.msra.mxu1 %v280_v7  ;;  %p294_p3 = por %p293_p2, %p292_p1 }
   0xa   :  { %264 = vmatprep.subr.bf16.mxu1 %v311_v1 }
   0xb   :  { %p295_p4 = pnand %p294_p3, %p288_p0 }
   0xd   :  { %265 = vmatpush3.bf16.msra.mxu1 %v281_v8 }
   0xe   :  { %266 = vmatprep.subr.bf16.mxu1 %v311_v1 }
  0x11   :  { %267 = vmatpush3.bf16.msra.mxu1 %v282_v9 }
  0xdc   :  { %v93_v11 = vpop.f32.mrb[0].mxu0 }
  0xdd   :  { %v94_v12 = vadd.f32 %v234_v10, %v93_v11  ;;  %v258_v13 = vpop.f32.mrb[1].mxu0 }
  0xde   :  { %v96_v14 = vpop.f32.mrb[2].mxu0 }
  0xdf   :  { %v100_v15 = vmul.f32 %v94_v12, %v94_v12  ;;  %v97_v16 = vadd.f32 %v234_v10, %v96_v14  ;;  %v259_v17 = vpop.f32.mrb[3].mxu0 }
  0xe1   :  { %v102_v18 = vmul.f32 %v100_v15, %v94_v12  ;;  %v101_v19 = vmul.f32 %v97_v16, %v97_v16 }
  0xe3   :  { %v104_v20 = vmul.f32 0.044715, %v102_v18  ;;  %v103_v21 = vmul.f32 %v101_v19, %v97_v16 }
  0xe5   :  { %v106_v22 = vadd.f32 %v104_v20, %v94_v12  ;;  %v105_v23 = vmul.f32 0.044715, %v103_v21 }
  0xe7   :  { %v108_v24 = vmul.f32 0.7978846, %v106_v22  ;;  %v107_v25 = vadd.f32 %v105_v23, %v97_v16 }
  0xe9   :  { %283 = vtanh.f32 %v108_v24  ;;  %v109_v26 = vmul.f32 0.7978846, %v107_v25 }
  0xeb   :  { %285 = vtanh.f32 %v109_v26 }
  0xf3   :  { %v284_v27 = vpop.eup %283 }
  0xf4   :  { %v112_v28 = vadd.f32 1.0, %v284_v27 }
  0xf5   :  { %v286_v29 = vpop.eup %285 }
  0xf6   :  { %v114_v30 = vmul.f32 0.5, %v112_v28  ;;  %v113_v31 = vadd.f32 1.0, %v286_v29 }
  0xf8   :  { %v115_v32 = vmul.f32 0.5, %v113_v31  ;;  %v116_v33 = vmul.f32 %v114_v30, %v94_v12 }
  0xfa   :  { %v117_v34 = vmul.f32 %v115_v32, %v97_v16 }
  0xfc   :  { %v120_v35 = vpack.c.bf16 %v117_v34, %v116_v33 }
  0xfe   :  { %269 = vmatmul.mubr.msk.bf16.vlgmr.msra.gmra.mrb[0].mxu1 %vm153_vm2, %v120_v35 }
 0x1d1   :  { %v191_v37 = vpop.f32.mrb[0].mxu1 }
 0x1d2   :  { %v198_v39 = vadd.f32 %v191_v37, %v118_v36  ;;  %v270_v40 = vpop.f32.mrb[1].mxu1 }
 0x1d3   :  { %v194_v41 = vpop.f32.mrb[2].mxu1 }
 0x1d4   :  { %200 = vst.msk [vmem:[#allocation2] sm:$0xff] %vm26_vm1, %v198_v39  ;;  %v199_v42 = vadd.f32 %v194_v41, %v119_v38  ;;  %v271_v43 = vpop.f32.mrb[3].mxu1 }
 0x1d6   :  { %201 = vst.msk [vmem:[#allocation2 + $0x8] sm:$0xff] %vm26_vm1, %v199_v42 }
 0x1db   :  { %v205_v45 = vld [vmem:[#allocation2] sm:$0xff] }
 0x1dc   :  { %v214_v46 = vadd.f32 %v243_v44, %v205_v45 }
 0x1dd   :  { %v206_v47 = vld [vmem:[#allocation2 + $0x8] sm:$0xff] }
 0x1de   :  { %v215_v48 = vadd.f32 %v243_v44, %v206_v47  ;;  %216 = vst.msk [vmem:[#allocation3] sm:$0xff] %vm26_vm1, %v214_v46 }
 0x1e0   :  { %217 = vst.msk [vmem:[#allocation3 + $0x8] sm:$0xff] %vm26_vm1, %v215_v48 }
 0x1e1   :  { %298 = shalt.err (!%p295_p4)
}
 0x1e2   :  { %s299_s13 = scalar_lea.hbm %s400_s5, 256 }
 0x1e3   :  { %p300_p5 = scmp.ne.s32.totalorder %s400_s5, %s299_s13  ;;  %p303_p6 = scmp.lt.u32.totalorder %s299_s13, %s400_s5 }
 0x1e5   :  { %p305_p7 = pnand %p303_p6, %p300_p5 }
 0x1e7   :  { %308 = shalt.err (!%p305_p7)
}
 0x1e8   :  { %s314_s18 = smov 128   ;;  %s315_s19 = smov 8  }
 0x1e9   :  { %229 = dma.vmem_to_hbm [thread:$0]  %s224_s10, 256, %s400_s5, [#allocation4], %s314_s18, %s314_s18, %s315_s19  }
 0x1ea   :  { %309 = dma.done.wait [#allocation4], 256  }
 0x1eb   :  { %310 = vsyncadd [#allocation4], 4294967040 }
 0x1ec   :  { %233 = vsyncpa [#allocation4], 1 }

</bundles_post_ra>
